<compile_context>
chip_gen: v7x
topology: tpu7x:2x2x1
jax: 0.10.0
libtpu: 0.0.40
codegen_flags: <defaults>
</compile_context>

<pallas_src>
import jax
import jax.numpy as jnp
from jax.experimental import pallas as pl
from jax.experimental.pallas import tpu as pltpu

BN_EPS = 1e-5


# ----------------------------------------------------------------------------
# helpers
# ----------------------------------------------------------------------------
def emb_sz_rule(n_cat):
    return min(600, round(1.6 * n_cat ** 0.56))


def get_1d_out_len(in_len, filter_size, stride):
    return (in_len - filter_size) // stride + 1


def _full_spec(shape):
    """Whole-array block for a grid=(1,) pallas_call."""
    shape = tuple(int(d) for d in shape)
    return pl.BlockSpec(shape, lambda i: (0,) * len(shape))


# ----------------------------------------------------------------------------
# Single fused kernel: conv channels (im2col matmuls) + pooling + FC + heads.
# `plan` contains only Python ints / tuples (no arrays -> nothing captured).
# ----------------------------------------------------------------------------
def make_fused_kernel(B, plan):
    seqs = plan["seqs"]
    n_seq = len(seqs)
    fc_plan = plan["fc"]
    n_fc = len(fc_plan)
    head = plan["head"]

    def kernel(*refs):
        it = iter(refs)
        static_ref = next(it)                              # (B, n_static) f32
        seq_refs = [next(it) for _ in range(n_seq)]        # (B*L_i, F_i) f32
        chan_wrefs = []
        for s in seqs:
            per_seq = []
            for ch in s["channels"]:
                layer_ws = [next(it) for _ in range(len(ch["layers"]))]  # bf16
                pool_w = next(it)                          # (T_last, 1) f32
                per_seq.append((layer_ws, pool_w))
            chan_wrefs.append(per_seq)
        fc_wrefs = [next(it) for _ in range(n_fc)]         # bf16 (n_in, n_out)
        headw_ref = next(it)                               # bf16 (fc_last, total_out)
        bias_ref = next(it)                                # (1, N_bias) f32 bank
        o_ref = next(it)                                   # (B, total_out) f32
        scratch_refs = list(it)                            # f32 inter-layer buffers

        sidx = 0
        conv_outs = []
        for si, s in enumerate(seqs):
            for ci, ch in enumerate(s["channels"]):
                layer_wrefs, poolw_ref = chan_wrefs[si][ci]
                in_ref, L_in = seq_refs[si], s["L0"]
                n_layers = len(ch["layers"])
                y = None
                for li, lc in enumerate(ch["layers"]):
                    K, st, T, nf = lc["K"], lc["stride"], lc["out_len"], lc["nf"]
                    # im2col patches: lane-concat K tap windows per batch block,
                    # sublane-concat across batch blocks -> (B*T, K*F_in).
                    rows = []
                    for b in range(B):
                        base = b * L_in
                        taps = []
                        for k in range(K):
                            sl = (pl.ds(base + k, T) if st == 1
                                  else pl.ds(base + k, T, st))
                            taps.append(in_ref[sl, :])
                        rows.append(taps[0] if K == 1
                                    else jnp.concatenate(taps, axis=1))
                    pat = rows[0] if B == 1 else jnp.concatenate(rows, axis=0)
                    # One matmul per conv layer (BN folded into W/bias), ReLU epilogue.
                    z = jnp.dot(pat.astype(jnp.bfloat16), layer_wrefs[li][...],
                                preferred_element_type=jnp.float32)
                    z = z + bias_ref[:, lc["bias_off"]: lc["bias_off"] + nf]
                    y = jnp.maximum(z, 0.0)                # (B*T, nf) f32
                    if li < n_layers - 1:
                        scratch_refs[sidx][...] = y        # single lane-dense store
                        in_ref, L_in = scratch_refs[sidx], T
                        sidx += 1
                # w_pooling: VPU multiply + time-axis (sublane) reduction per batch.
                last = ch["layers"][-1]
                T_last, nf_last = last["out_len"], last["nf"]
                pw = poolw_ref[...]                        # (T_last, 1) f32
                pooled_rows = []
                for b in range(B):
                    yb = y[b * T_last:(b + 1) * T_last, :]
                    pooled_rows.append(jnp.sum(yb * pw, axis=0, keepdims=True))
                pooled = (pooled_rows[0] if B == 1
                          else jnp.concatenate(pooled_rows, axis=0))   # (B, nf_last)
                poff = ch["pool_bias_off"]
                conv_outs.append(pooled + bias_ref[:, poff: poff + nf_last])

        # FC input assembled in-register: [static_num | embeddings | conv outs].
        pieces = [static_ref[...]] + conv_outs
        h = pieces[0] if len(pieces) == 1 else jnp.concatenate(pieces, axis=1)

        # FC stack: Linear -> ReLU (BN affine folded into the next layer's W/b).
        for l in range(n_fc):
            n_out, boff = fc_plan[l]["n_out"], fc_plan[l]["bias_off"]
            z = jnp.dot(h.astype(jnp.bfloat16), fc_wrefs[l][...],
                        preferred_element_type=jnp.float32)
            h = jnp.maximum(z + bias_ref[:, boff: boff + n_out], 0.0)

        # All heads as one lane-concatenated matmul (last FC's BN pre-folded).
        tot, hboff = head["total_out"], head["bias_off"]
        z = jnp.dot(h.astype(jnp.bfloat16), headw_ref[...],
                    preferred_element_type=jnp.float32)
        z = z + bias_ref[:, hboff: hboff + tot]

        # RangeSigmoid on static per-head column slices (Python float constants).
        out_pieces, off = [], 0
        for nf, rng in head["cfgs"]:
            piece = z[:, off: off + nf]
            if rng is not None:
                lo, hi = float(rng[0]), float(rng[1])
                piece = jax.nn.sigmoid(piece) * (hi - lo) + lo
            out_pieces.append(piece)
            off += nf
        o_ref[...] = (out_pieces[0] if len(out_pieces) == 1
                      else jnp.concatenate(out_pieces, axis=1))

    return kernel


def _extract_plan(kp):
    """Static (pure-Python) description of the network for the kernel closure."""
    seqs = []
    for s in kp["seqs"]:
        channels = []
        for ch in s["channels"]:
            channels.append(dict(
                layers=[dict(K=lp["K"], stride=lp["stride"], out_len=lp["out_len"],
                             nf=lp["nf"], bias_off=lp["bias_off"])
                        for lp in ch["layers"]],
                pool_bias_off=ch["pool_bias_off"]))
        seqs.append(dict(L0=s["L0"], F0=s["F0"], channels=channels))
    fc = [dict(n_out=f["n_out"], bias_off=f["bias_off"]) for f in kp["fc"]]
    head = dict(total_out=kp["head"]["total_out"],
                bias_off=kp["head"]["bias_off"],
                cfgs=kp["head"]["cfgs"])
    return dict(seqs=seqs, fc=fc, head=head)


# ----------------------------------------------------------------------------
# Forward pass (embedding gather / concat stay as JAX glue)
# ----------------------------------------------------------------------------
def deep_cnn_forward(kp, ins):
    (static_num,), (static_cat,), seqs = ins
    B = int(static_num.shape[0])
    embs = [tab[static_cat[:, i]] for i, tab in enumerate(kp["emb_tables"])]
    static = jnp.concatenate([static_num] + embs, axis=1).astype(jnp.float32)

    inputs = [static]
    for s_in in seqs:
        Bs, L, F = s_in.shape
        inputs.append(s_in.reshape(Bs * L, F).astype(jnp.float32))
    for s in kp["seqs"]:
        for ch in s["channels"]:
            for lp in ch["layers"]:
                inputs.append(lp["w"])
            inputs.append(ch["pool_w"])
    for fc in kp["fc"]:
        inputs.append(fc["w"])
    inputs.append(kp["head"]["w"])
    inputs.append(kp["bias_bank"])

    in_specs = [_full_spec(a.shape) for a in inputs]

    scratch = []
    for s in kp["seqs"]:
        for ch in s["channels"]:
            for lp in ch["layers"][:-1]:
                scratch.append(pltpu.VMEM((B * lp["out_len"], lp["nf"]), jnp.float32))

    total_out = kp["head"]["total_out"]
    head_out = pl.pallas_call(
        make_fused_kernel(B, _extract_plan(kp)),
        out_shape=jax.ShapeDtypeStruct((B, total_out), jnp.float32),
        grid=(1,),
        in_specs=in_specs,
        out_specs=_full_spec((B, total_out)),
        scratch_shapes=scratch,
        compiler_params=pltpu.CompilerParams(dimension_semantics=("arbitrary",)),
    )(*inputs)

    outs, off = [], 0
    for nf, _ in kp["head"]["cfgs"]:
        outs.append(head_out[:, off:off + nf])
        off += nf
    return outs


# ----------------------------------------------------------------------------
# Deterministic parameter init (PyTorch-layout, f32 — used by the reference)
# ----------------------------------------------------------------------------
def _bn_affine(keys, n):
    gamma = 1.0 + 0.1 * jax.random.normal(next(keys), (n,), jnp.float32)
    beta = 0.1 * jax.random.normal(next(keys), (n,), jnp.float32)
    rmean = 0.1 * jax.random.normal(next(keys), (n,), jnp.float32)
    rvar = 1.0 + 0.1 * jnp.abs(jax.random.normal(next(keys), (n,), jnp.float32))
    s = gamma / jnp.sqrt(rvar + BN_EPS)
    t = beta - rmean * s
    return s, t


def init_params(key, config):
    keys = iter(jax.random.split(key, 512))
    nrm = lambda shape, scale=0.1: scale * jax.random.normal(next(keys), shape, jnp.float32)

    params = {}
    params["emb_tables"] = [nrm((n, emb_sz_rule(n)), 0.3) for n in config["static_cat_ins"]]

    conv_seqs = []
    for i in range(len(config["seq_feat"])):
        chs = []
        for j in range(len(config["num_filter"][i])):
            nfs = config["num_filter"][i][j]
            fss = config["filter_size"][i][j]
            sts = config["stride"][i][j]
            seq_feats = [config["seq_feat"][i]] + nfs[:-1]
            L = config["seq_len"][i]
            layers = []
            for w_in, nf, fs, st in zip(seq_feats, nfs, fss, sts):
                bn_s, bn_t = _bn_affine(keys, nf)
                layers.append(dict(
                    w=nrm((nf, fs * w_in), 0.2),   # PyTorch conv weight (nf,1,fs,w_in) flattened
                    b=nrm((nf,), 0.1),
                    bn_s=bn_s, bn_t=bn_t,
                    filter_size=fs, stride=st))
                L = get_1d_out_len(L, fs, st)
            chs.append(dict(layers=layers,
                            pool_w=nrm((L,), 0.3),   # nn.Conv1d(1,1,(1,L)) weight
                            pool_b=nrm((1,), 0.1)))
        conv_seqs.append(chs)
    params["conv_seqs"] = conv_seqs

    lin_in = (sum(emb_sz_rule(n) for n in config["static_cat_ins"])
              + config["static_num_ins"]
              + sum(config["num_filter"][i][j][-1]
                    for i in range(len(config["num_filter"]))
                    for j in range(len(config["num_filter"][i]))))
    fc_sizes = [lin_in] + config["fc_sizes"]
    fcs = []
    for ni, nf in zip(fc_sizes[:-1], fc_sizes[1:]):
        bn_s, bn_t = _bn_affine(keys, nf)
        fcs.append(dict(w=nrm((nf, ni), 0.2), b=nrm((nf,), 0.1), bn_s=bn_s, bn_t=bn_t))
    params["fc"] = fcs

    heads = []
    for task, rng, nf in zip(config["out_tasks"], config["out_ranges"], config["out_features"]):
        use_range = (task == "regression") and (rng is not None)
        heads.append(dict(w=nrm((nf, fc_sizes[-1]), 0.2), b=nrm((nf,), 0.1),
                          range=rng if use_range else None))
    params["heads"] = heads
    return params


# ----------------------------------------------------------------------------
# One-time weight preparation: transpose, BN-fold (conv: in-layer; FC: into the
# next layer / heads), bf16 cast, single 2-D conv weight slabs, packed bias bank.
# ----------------------------------------------------------------------------
def prepare_kernel_params(params, config):
    kp = {"emb_tables": params["emb_tables"]}

    bias_parts = []

    def add_bias(vec):
        vec = jnp.asarray(vec, jnp.float32).reshape(-1)
        off = sum(int(p.shape[0]) for p in bias_parts)
        bias_parts.append(vec)
        return off

    kseqs = []
    for i, chs in enumerate(params["conv_seqs"]):
        L0 = config["seq_len"][i]
        F0 = config["seq_feat"][i]
        kchs = []
        for ch in chs:
            L_in, f_in = L0, F0
            layers = []
            for lp in ch["layers"]:
                nf = int(lp["b"].shape[0])
                K, st = lp["filter_size"], lp["stride"]
                T = get_1d_out_len(L_in, K, st)
                # relu(bn(conv(x))) -> fold BN scale/shift into weight/bias (f32).
                w = (lp["w"] * lp["bn_s"][:, None]).T.astype(jnp.bfloat16)  # (K*f_in, nf)
                boff = add_bias(lp["b"] * lp["bn_s"] + lp["bn_t"])
                layers.append(dict(w=w, K=K, stride=st, out_len=T, nf=nf, bias_off=boff))
                L_in, f_in = T, nf
            pboff = add_bias(jnp.broadcast_to(ch["pool_b"].reshape(1), (f_in,)))
            kchs.append(dict(layers=layers,
                             pool_w=ch["pool_w"].reshape(L_in, 1).astype(jnp.float32),
                             pool_bias_off=pboff))
        kseqs.append(dict(L0=L0, F0=F0, channels=kchs))
    kp["seqs"] = kseqs

    # FC: fold the previous layer's post-ReLU BN affine into this layer's W/b (f32).
    s_prev, t_prev = None, None
    kfc = []
    for fc in params["fc"]:
        W = fc["w"].T.astype(jnp.float32)          # (n_in, n_out)
        b = fc["b"].astype(jnp.float32)
        if s_prev is not None:
            b = b + t_prev @ W
            W = W * s_prev[:, None]
        boff = add_bias(b)
        kfc.append(dict(w=W.astype(jnp.bfloat16), n_out=int(W.shape[1]), bias_off=boff))
        s_prev, t_prev = fc["bn_s"], fc["bn_t"]
    kp["fc"] = kfc

    # Heads: one lane-concatenated matmul, last FC's BN folded in (f32).
    Wh = jnp.concatenate([h["w"].T for h in params["heads"]], axis=1).astype(jnp.float32)
    bh = jnp.concatenate([h["b"] for h in params["heads"]]).astype(jnp.float32)
    if s_prev is not None:
        bh = bh + t_prev @ Wh
        Wh = Wh * s_prev[:, None]
    hboff = add_bias(bh)
    cfgs = tuple((int(h["w"].shape[0]), h["range"]) for h in params["heads"])
    kp["head"] = dict(w=Wh.astype(jnp.bfloat16), total_out=int(Wh.shape[1]),
                      bias_off=hboff, cfgs=cfgs)

    kp["bias_bank"] = jnp.concatenate(bias_parts).reshape(1, -1)
    return kp


# ----------------------------------------------------------------------------
# Pure-jnp f32 reference (same eval-mode semantics) for a sanity check
# ----------------------------------------------------------------------------
def reference_forward(params, ins):
    (static_num,), (static_cat,), seqs = ins
    embs = [tab[static_cat[:, i]] for i, tab in enumerate(params["emb_tables"])]
    x_cat = jnp.concatenate(embs, axis=1)
    seq_outs = []
    for i, s_in in enumerate(seqs):
        ch_outs = []
        for ch in params["conv_seqs"][i]:
            y = s_in
            for lp in ch["layers"]:
                B, L, F = y.shape
                K, st = lp["filter_size"], lp["stride"]
                out_len = get_1d_out_len(L, K, st)
                idx = jnp.arange(out_len)[:, None] * st + jnp.arange(K)[None, :]
                pat = y[:, idx, :].reshape(B, out_len, K * F)
                z = jnp.einsum("bok,nk->bon", pat, lp["w"]) + lp["b"]
                y = jnp.maximum(z * lp["bn_s"] + lp["bn_t"], 0.0)
            pooled = jnp.einsum("btn,t->bn", y, ch["pool_w"]) + ch["pool_b"]
            ch_outs.append(pooled)
        seq_outs.append(jnp.concatenate(ch_outs, axis=1))
    x = jnp.concatenate([static_num, x_cat] + seq_outs, axis=1)
    for fc in params["fc"]:
        z = x @ fc["w"].T + fc["b"]
        x = jnp.maximum(z, 0.0) * fc["bn_s"] + fc["bn_t"]
    outs = []
    for h in params["heads"]:
        z = x @ h["w"].T + h["b"]
        if h["range"] is not None:
            lo, hi = h["range"]
            z = jax.nn.sigmoid(z) * (hi - lo) + lo
        outs.append(z)
    return outs


# ----------------------------------------------------------------------------
if __name__ == "__main__":
    config = dict(
        static_cat_ins=[10, 20],          # emb sizes 6 and 9
        static_num_ins=5,
        emb_p=0.1,
        seq_feat=[4],
        seq_len=[16],
        num_filter=[[[8, 12]]],           # 1 sequence, 1 conv channel, 2 conv layers
        filter_size=[[[3, 2]]],
        stride=[[[1, 2]]],                # conv out lens: 14 -> 7
        fc_sizes=[24, 16],
        fc_p=[0.1, 0.1],
        out_tasks=["regression", "classification"],
        out_ranges=[(0.0, 10.0), None],
        out_features=[1, 3],
    )

    key = jax.random.PRNGKey(0)
    kp_key, kx = jax.random.split(key)
    params = init_params(kp_key, config)
    kparams = prepare_kernel_params(params, config)

    B = 2
    k1, k2, k3 = jax.random.split(kx, 3)
    static_num = jax.random.normal(k1, (B, config["static_num_ins"]), jnp.float32)
    cat_keys = jax.random.split(k2, len(config["static_cat_ins"]))
    static_cat = jnp.stack(
        [jax.random.randint(kk, (B,), 0, n) for kk, n in zip(cat_keys, config["static_cat_ins"])],
        axis=1)
    seqs = [jax.random.normal(k3, (B, config["seq_len"][0], config["seq_feat"][0]), jnp.float32)]
    ins = ([static_num], [static_cat], seqs)   # matches (static_num, static_cat, seq) with [0]-indexing

    outs = deep_cnn_forward(kparams, ins)
    outs = jax.block_until_ready(outs)

    refs = reference_forward(params, ins)
    assert len(outs) == len(refs)
    for o, r in zip(outs, refs):
        assert o.shape == r.shape, (o.shape, r.shape)
        # bf16 MXU weights (f32 accumulation) vs f32 reference: loosened tolerance.
        assert jnp.allclose(o, r, rtol=5e-2, atol=5e-2), (o, r)

    print("KERNEL_OK")
</pallas_src>

<mosaic_0001>
module attributes {stable_mosaic.version = 11 : i64} {
  func.func @kernel(%arg0: i32, %arg1: memref<2x20xf32, #tpu.memory_space<vmem>>, %arg2: memref<32x4xf32, #tpu.memory_space<vmem>>, %arg3: memref<12x8xbf16, #tpu.memory_space<vmem>>, %arg4: memref<16x12xbf16, #tpu.memory_space<vmem>>, %arg5: memref<7x1xf32, #tpu.memory_space<vmem>>, %arg6: memref<32x24xbf16, #tpu.memory_space<vmem>>, %arg7: memref<24x16xbf16, #tpu.memory_space<vmem>>, %arg8: memref<16x4xbf16, #tpu.memory_space<vmem>>, %arg9: memref<1x76xf32, #tpu.memory_space<vmem>>, %arg10: memref<2x4xf32, #tpu.memory_space<vmem>>, %arg11: memref<28x8xf32, #tpu.memory_space<vmem>>) attributes {dimension_semantics = [#tpu.dimension_semantics<arbitrary>], iteration_bounds = array<i64: 1>, scalar_prefetch = 0 : i64, scratch_operands = 1 : i64, tpu.core_type = #tpu.core_type<tc>, window_params = [{pipeline_mode = #tpu.pipeline_mode<synchronous>, transform_indices = @transform_0, window_bounds = array<i64: 2, 20>}, {pipeline_mode = #tpu.pipeline_mode<synchronous>, transform_indices = @transform_1, window_bounds = array<i64: 32, 4>}, {pipeline_mode = #tpu.pipeline_mode<synchronous>, transform_indices = @transform_2, window_bounds = array<i64: 12, 8>}, {pipeline_mode = #tpu.pipeline_mode<synchronous>, transform_indices = @transform_3, window_bounds = array<i64: 16, 12>}, {pipeline_mode = #tpu.pipeline_mode<synchronous>, transform_indices = @transform_4, window_bounds = array<i64: 7, 1>}, {pipeline_mode = #tpu.pipeline_mode<synchronous>, transform_indices = @transform_5, window_bounds = array<i64: 32, 24>}, {pipeline_mode = #tpu.pipeline_mode<synchronous>, transform_indices = @transform_6, window_bounds = array<i64: 24, 16>}, {pipeline_mode = #tpu.pipeline_mode<synchronous>, transform_indices = @transform_7, window_bounds = array<i64: 16, 4>}, {pipeline_mode = #tpu.pipeline_mode<synchronous>, transform_indices = @transform_8, window_bounds = array<i64: 1, 76>}, {pipeline_mode = #tpu.pipeline_mode<synchronous>, transform_indices = @transform_9, window_bounds = array<i64: 2, 4>}]} {
    %c0 = arith.constant 0 : index
    %c0_0 = arith.constant 0 : index
    %0 = vector.load %arg2[%c0, %c0_0] : memref<32x4xf32, #tpu.memory_space<vmem>>, vector<14x4xf32>
    %c1 = arith.constant 1 : index
    %c0_1 = arith.constant 0 : index
    %1 = vector.load %arg2[%c1, %c0_1] : memref<32x4xf32, #tpu.memory_space<vmem>>, vector<14x4xf32>
    %c2 = arith.constant 2 : index
    %c0_2 = arith.constant 0 : index
    %2 = vector.load %arg2[%c2, %c0_2] : memref<32x4xf32, #tpu.memory_space<vmem>>, vector<14x4xf32>
    %3 = tpu.concatenate %0, %1, %2 in 1 : vector<14x4xf32>, vector<14x4xf32>, vector<14x4xf32> -> vector<14x12xf32>
    %c16 = arith.constant 16 : index
    %c0_3 = arith.constant 0 : index
    %4 = vector.load %arg2[%c16, %c0_3] : memref<32x4xf32, #tpu.memory_space<vmem>>, vector<14x4xf32>
    %c17 = arith.constant 17 : index
    %c0_4 = arith.constant 0 : index
    %5 = vector.load %arg2[%c17, %c0_4] : memref<32x4xf32, #tpu.memory_space<vmem>>, vector<14x4xf32>
    %c18 = arith.constant 18 : index
    %c0_5 = arith.constant 0 : index
    %6 = vector.load %arg2[%c18, %c0_5] : memref<32x4xf32, #tpu.memory_space<vmem>>, vector<14x4xf32>
    %7 = tpu.concatenate %4, %5, %6 in 1 : vector<14x4xf32>, vector<14x4xf32>, vector<14x4xf32> -> vector<14x12xf32>
    %8 = tpu.concatenate %3, %7 in 0 : vector<14x12xf32>, vector<14x12xf32> -> vector<28x12xf32>
    %9 = arith.truncf %8 : vector<28x12xf32> to vector<28x12xbf16>
    %c0_6 = arith.constant 0 : index
    %c0_7 = arith.constant 0 : index
    %10 = vector.load %arg3[%c0_6, %c0_7] : memref<12x8xbf16, #tpu.memory_space<vmem>>, vector<12x8xbf16>
    %cst = arith.constant dense<0.000000e+00> : vector<28x8xf32>
    %11 = tpu.matmul %9, %10, %cst {dimension_numbers = #tpu.dot_dimension_numbers<[1], [0], [0], [1], [0, 0, 1, 1], [], []>} : vector<28x12xbf16>, vector<12x8xbf16>, vector<28x8xf32> -> vector<28x8xf32>
    %c0_8 = arith.constant 0 : index
    %c0_9 = arith.constant 0 : index
    %12 = vector.load %arg9[%c0_8, %c0_9] : memref<1x76xf32, #tpu.memory_space<vmem>>, vector<1x8xf32>
    %13 = vector.broadcast %12 : vector<1x8xf32> to vector<28x8xf32>
    %14 = arith.addf %11, %13 : vector<28x8xf32>
    %cst_10 = arith.constant 0.000000e+00 : f32
    %15 = vector.broadcast %cst_10 : f32 to vector<28x8xf32>
    %16 = arith.maximumf %14, %15 : vector<28x8xf32>
    %c0_11 = arith.constant 0 : index
    %c0_12 = arith.constant 0 : index
    %17 = vector.load %arg11[%c0_11, %c0_12] : memref<28x8xf32, #tpu.memory_space<vmem>>, vector<28x8xf32>
    tpu.vector_store %arg11[%c0_11, %c0_12], %16 {strides = array<i32>} : memref<28x8xf32, #tpu.memory_space<vmem>>, vector<28x8xf32>,
    %c0_13 = arith.constant 0 : index
    %c0_14 = arith.constant 0 : index
    %18 = tpu.strided_load %arg11[%c0_13, %c0_14] {strides = array<i32: 2, 1>} : memref<28x8xf32, #tpu.memory_space<vmem>>, vector<7x8xf32>
    %c1_15 = arith.constant 1 : index
    %c0_16 = arith.constant 0 : index
    %19 = tpu.strided_load %arg11[%c1_15, %c0_16] {strides = array<i32: 2, 1>} : memref<28x8xf32, #tpu.memory_space<vmem>>, vector<7x8xf32>
    %20 = tpu.concatenate %18, %19 in 1 : vector<7x8xf32>, vector<7x8xf32> -> vector<7x16xf32>
    %c14 = arith.constant 14 : index
    %c0_17 = arith.constant 0 : index
    %21 = tpu.strided_load %arg11[%c14, %c0_17] {strides = array<i32: 2, 1>} : memref<28x8xf32, #tpu.memory_space<vmem>>, vector<7x8xf32>
    %c15 = arith.constant 15 : index
    %c0_18 = arith.constant 0 : index
    %22 = tpu.strided_load %arg11[%c15, %c0_18] {strides = array<i32: 2, 1>} : memref<28x8xf32, #tpu.memory_space<vmem>>, vector<7x8xf32>
    %23 = tpu.concatenate %21, %22 in 1 : vector<7x8xf32>, vector<7x8xf32> -> vector<7x16xf32>
    %24 = tpu.concatenate %20, %23 in 0 : vector<7x16xf32>, vector<7x16xf32> -> vector<14x16xf32>
    %25 = arith.truncf %24 : vector<14x16xf32> to vector<14x16xbf16>
    %c0_19 = arith.constant 0 : index
    %c0_20 = arith.constant 0 : index
    %26 = vector.load %arg4[%c0_19, %c0_20] : memref<16x12xbf16, #tpu.memory_space<vmem>>, vector<16x12xbf16>
    %cst_21 = arith.constant dense<0.000000e+00> : vector<14x12xf32>
    %27 = tpu.matmul %25, %26, %cst_21 {dimension_numbers = #tpu.dot_dimension_numbers<[1], [0], [0], [1], [0, 0, 1, 1], [], []>} : vector<14x16xbf16>, vector<16x12xbf16>, vector<14x12xf32> -> vector<14x12xf32>
    %c0_22 = arith.constant 0 : index
    %c8 = arith.constant 8 : index
    %28 = vector.load %arg9[%c0_22, %c8] : memref<1x76xf32, #tpu.memory_space<vmem>>, vector<1x12xf32>
    %29 = vector.broadcast %28 : vector<1x12xf32> to vector<14x12xf32>
    %30 = arith.addf %27, %29 : vector<14x12xf32>
    %cst_23 = arith.constant 0.000000e+00 : f32
    %31 = vector.broadcast %cst_23 : f32 to vector<14x12xf32>
    %32 = arith.maximumf %30, %31 : vector<14x12xf32>
    %c0_24 = arith.constant 0 : index
    %c0_25 = arith.constant 0 : index
    %33 = vector.load %arg5[%c0_24, %c0_25] : memref<7x1xf32, #tpu.memory_space<vmem>>, vector<7x1xf32>
    %34 = vector.extract_strided_slice %32 {offsets = [0, 0], sizes = [7, 12], strides = [1, 1]} : vector<14x12xf32> to vector<7x12xf32>
    %35 = vector.broadcast %33 : vector<7x1xf32> to vector<7x12xf32>
    %36 = arith.mulf %34, %35 : vector<7x12xf32>
    %cst_26 = arith.constant dense<0.000000e+00> : vector<12xf32>
    %37 = vector.multi_reduction <add>, %36, %cst_26 [0] : vector<7x12xf32> to vector<12xf32>
    %38 = vector.shape_cast %37 : vector<12xf32> to vector<1x12xf32>
    %39 = vector.extract_strided_slice %32 {offsets = [7, 0], sizes = [7, 12], strides = [1, 1]} : vector<14x12xf32> to vector<7x12xf32>
    %40 = vector.broadcast %33 : vector<7x1xf32> to vector<7x12xf32>
    %41 = arith.mulf %39, %40 : vector<7x12xf32>
    %cst_27 = arith.constant dense<0.000000e+00> : vector<12xf32>
    %42 = vector.multi_reduction <add>, %41, %cst_27 [0] : vector<7x12xf32> to vector<12xf32>
    %43 = vector.shape_cast %42 : vector<12xf32> to vector<1x12xf32>
    %44 = tpu.concatenate %38, %43 in 0 : vector<1x12xf32>, vector<1x12xf32> -> vector<2x12xf32>
    %c0_28 = arith.constant 0 : index
    %c20 = arith.constant 20 : index
    %45 = vector.load %arg9[%c0_28, %c20] : memref<1x76xf32, #tpu.memory_space<vmem>>, vector<1x12xf32>
    %46 = vector.broadcast %45 : vector<1x12xf32> to vector<2x12xf32>
    %47 = arith.addf %44, %46 : vector<2x12xf32>
    %c0_29 = arith.constant 0 : index
    %c0_30 = arith.constant 0 : index
    %48 = vector.load %arg1[%c0_29, %c0_30] : memref<2x20xf32, #tpu.memory_space<vmem>>, vector<2x20xf32>
    %49 = tpu.concatenate %48, %47 in 1 : vector<2x20xf32>, vector<2x12xf32> -> vector<2x32xf32>
    %50 = arith.truncf %49 : vector<2x32xf32> to vector<2x32xbf16>
    %c0_31 = arith.constant 0 : index
    %c0_32 = arith.constant 0 : index
    %51 = vector.load %arg6[%c0_31, %c0_32] : memref<32x24xbf16, #tpu.memory_space<vmem>>, vector<32x24xbf16>
    %cst_33 = arith.constant dense<0.000000e+00> : vector<2x24xf32>
    %52 = tpu.matmul %50, %51, %cst_33 {dimension_numbers = #tpu.dot_dimension_numbers<[1], [0], [0], [1], [0, 0, 1, 1], [], []>} : vector<2x32xbf16>, vector<32x24xbf16>, vector<2x24xf32> -> vector<2x24xf32>
    %c0_34 = arith.constant 0 : index
    %c32 = arith.constant 32 : index
    %53 = vector.load %arg9[%c0_34, %c32] : memref<1x76xf32, #tpu.memory_space<vmem>>, vector<1x24xf32>
    %54 = vector.broadcast %53 : vector<1x24xf32> to vector<2x24xf32>
    %55 = arith.addf %52, %54 : vector<2x24xf32>
    %cst_35 = arith.constant 0.000000e+00 : f32
    %56 = vector.broadcast %cst_35 : f32 to vector<2x24xf32>
    %57 = arith.maximumf %55, %56 : vector<2x24xf32>
    %58 = arith.truncf %57 : vector<2x24xf32> to vector<2x24xbf16>
    %c0_36 = arith.constant 0 : index
    %c0_37 = arith.constant 0 : index
    %59 = vector.load %arg7[%c0_36, %c0_37] : memref<24x16xbf16, #tpu.memory_space<vmem>>, vector<24x16xbf16>
    %cst_38 = arith.constant dense<0.000000e+00> : vector<2x16xf32>
    %60 = tpu.matmul %58, %59, %cst_38 {dimension_numbers = #tpu.dot_dimension_numbers<[1], [0], [0], [1], [0, 0, 1, 1], [], []>} : vector<2x24xbf16>, vector<24x16xbf16>, vector<2x16xf32> -> vector<2x16xf32>
    %c0_39 = arith.constant 0 : index
    %c56 = arith.constant 56 : index
    %61 = vector.load %arg9[%c0_39, %c56] : memref<1x76xf32, #tpu.memory_space<vmem>>, vector<1x16xf32>
    %62 = vector.broadcast %61 : vector<1x16xf32> to vector<2x16xf32>
    %63 = arith.addf %60, %62 : vector<2x16xf32>
    %cst_40 = arith.constant 0.000000e+00 : f32
    %64 = vector.broadcast %cst_40 : f32 to vector<2x16xf32>
    %65 = arith.maximumf %63, %64 : vector<2x16xf32>
    %66 = arith.truncf %65 : vector<2x16xf32> to vector<2x16xbf16>
    %c0_41 = arith.constant 0 : index
    %c0_42 = arith.constant 0 : index
    %67 = vector.load %arg8[%c0_41, %c0_42] : memref<16x4xbf16, #tpu.memory_space<vmem>>, vector<16x4xbf16>
    %cst_43 = arith.constant dense<0.000000e+00> : vector<2x4xf32>
    %68 = tpu.matmul %66, %67, %cst_43 {dimension_numbers = #tpu.dot_dimension_numbers<[1], [0], [0], [1], [0, 0, 1, 1], [], []>} : vector<2x16xbf16>, vector<16x4xbf16>, vector<2x4xf32> -> vector<2x4xf32>
    %c0_44 = arith.constant 0 : index
    %c72 = arith.constant 72 : index
    %69 = vector.load %arg9[%c0_44, %c72] : memref<1x76xf32, #tpu.memory_space<vmem>>, vector<1x4xf32>
    %70 = vector.broadcast %69 : vector<1x4xf32> to vector<2x4xf32>
    %71 = arith.addf %68, %70 : vector<2x4xf32>
    %72 = vector.extract_strided_slice %71 {offsets = [0, 0], sizes = [2, 1], strides = [1, 1]} : vector<2x4xf32> to vector<2x1xf32>
    %73 = arith.negf %72 : vector<2x1xf32>
    %74 = math.exp %73 : vector<2x1xf32>
    %cst_45 = arith.constant 1.000000e+00 : f32
    %75 = vector.broadcast %cst_45 : f32 to vector<2x1xf32>
    %76 = arith.addf %75, %74 : vector<2x1xf32>
    %77 = arith.divf %75, %76 : vector<2x1xf32>
    %cst_46 = arith.constant 1.000000e+01 : f32
    %78 = vector.broadcast %cst_46 : f32 to vector<2x1xf32>
    %79 = arith.mulf %77, %78 : vector<2x1xf32>
    %cst_47 = arith.constant 0.000000e+00 : f32
    %80 = vector.broadcast %cst_47 : f32 to vector<2x1xf32>
    %81 = arith.addf %79, %80 : vector<2x1xf32>
    %82 = vector.extract_strided_slice %71 {offsets = [0, 1], sizes = [2, 3], strides = [1, 1]} : vector<2x4xf32> to vector<2x3xf32>
    %83 = tpu.concatenate %81, %82 in 1 : vector<2x1xf32>, vector<2x3xf32> -> vector<2x4xf32>
    %c0_48 = arith.constant 0 : index
    %c0_49 = arith.constant 0 : index
    %84 = vector.load %arg10[%c0_48, %c0_49] : memref<2x4xf32, #tpu.memory_space<vmem>>, vector<2x4xf32>
    tpu.vector_store %arg10[%c0_48, %c0_49], %83 {strides = array<i32>} : memref<2x4xf32, #tpu.memory_space<vmem>>, vector<2x4xf32>,
    return
  }
  func.func @transform_0(%arg0: i32) -> (i32, i32) {
    %c0_i32 = arith.constant 0 : i32
    %c0_i32_0 = arith.constant 0 : i32
    %c0_i32_1 = arith.constant 0 : i32
    return %c0_i32, %c0_i32_0 : i32, i32
  }
  func.func @transform_1(%arg0: i32) -> (i32, i32) {
    %c0_i32 = arith.constant 0 : i32
    %c0_i32_0 = arith.constant 0 : i32
    %c0_i32_1 = arith.constant 0 : i32
    return %c0_i32, %c0_i32_0 : i32, i32
  }
  func.func @transform_2(%arg0: i32) -> (i32, i32) {
    %c0_i32 = arith.constant 0 : i32
    %c0_i32_0 = arith.constant 0 : i32
    %c0_i32_1 = arith.constant 0 : i32
    return %c0_i32, %c0_i32_0 : i32, i32
  }
  func.func @transform_3(%arg0: i32) -> (i32, i32) {
    %c0_i32 = arith.constant 0 : i32
    %c0_i32_0 = arith.constant 0 : i32
    %c0_i32_1 = arith.constant 0 : i32
    return %c0_i32, %c0_i32_0 : i32, i32
  }
  func.func @transform_4(%arg0: i32) -> (i32, i32) {
    %c0_i32 = arith.constant 0 : i32
    %c0_i32_0 = arith.constant 0 : i32
    %c0_i32_1 = arith.constant 0 : i32
    return %c0_i32, %c0_i32_0 : i32, i32
  }
  func.func @transform_5(%arg0: i32) -> (i32, i32) {
    %c0_i32 = arith.constant 0 : i32
    %c0_i32_0 = arith.constant 0 : i32
    %c0_i32_1 = arith.constant 0 : i32
    return %c0_i32, %c0_i32_0 : i32, i32
  }
  func.func @transform_6(%arg0: i32) -> (i32, i32) {
    %c0_i32 = arith.constant 0 : i32
    %c0_i32_0 = arith.constant 0 : i32
    %c0_i32_1 = arith.constant 0 : i32
    return %c0_i32, %c0_i32_0 : i32, i32
  }
  func.func @transform_7(%arg0: i32) -> (i32, i32) {
    %c0_i32 = arith.constant 0 : i32
    %c0_i32_0 = arith.constant 0 : i32
    %c0_i32_1 = arith.constant 0 : i32
    return %c0_i32, %c0_i32_0 : i32, i32
  }
  func.func @transform_8(%arg0: i32) -> (i32, i32) {
    %c0_i32 = arith.constant 0 : i32
    %c0_i32_0 = arith.constant 0 : i32
    %c0_i32_1 = arith.constant 0 : i32
    return %c0_i32, %c0_i32_0 : i32, i32
  }
  func.func @transform_9(%arg0: i32) -> (i32, i32) {
    %c0_i32 = arith.constant 0 : i32
    %c0_i32_0 = arith.constant 0 : i32
    %c0_i32_1 = arith.constant 0 : i32
    return %c0_i32, %c0_i32_0 : i32, i32
  }
}

</mosaic_0001>

<bundles_post_ra>
// kernel: tpu_custom_call.1
= control target key start
LH: loop header
LB: loop body
LE: loop exit
PB: predicated region body
PF: predicated region fallthrough
CT: control target
= control target key end

     0   :  { %s657_s25 = smov 4   ;;  %vm90_vm0 = vcmask 1045504   ;;  %s658_s28 = smov 8   ;;  %s847_s0 = inlined_call_operand.vmem [shape: f32[2,20], index: 0, kind: input, shape index: {}]   ;;  %s848_s1 = inlined_call_operand.vmem [shape: f32[32,4], index: 1, kind: input, shape index: {}]   ;;  %s849_s2 = inlined_call_operand.vmem [shape: bf16[12,8], index: 2, kind: input, shape index: {}]   ;;  %s850_s3 = inlined_call_operand.vmem [shape: bf16[16,12], index: 3, kind: input, shape index: {}]   ;;  %s851_s4 = inlined_call_operand.vmem [shape: f32[7,1], index: 4, kind: input, shape index: {}]   ;;  %s852_s5 = inlined_call_operand.vmem [shape: bf16[32,24], index: 5, kind: input, shape index: {}]   ;;  %s853_s6 = inlined_call_operand.vmem [shape: bf16[24,16], index: 6, kind: input, shape index: {}]   ;;  %s854_s7 = inlined_call_operand.vmem [shape: bf16[16,4], index: 7, kind: input, shape index: {}]   ;;  %s855_s8 = inlined_call_operand.vmem [shape: f32[1,76], index: 8, kind: input, shape index: {}]   ;;  %s856_s9 = inlined_call_operand.hbm [shape: f32[2,4], index: 9, kind: output, shape index: {}]  }
   0x1   :  { %v64_v0 = vld [vmem:[%s848_s1 + $0x11] sm:$0xff]  ;;  %v65_v1 = vld [vmem:[%s848_s1 + $0x19] sm:$0x3f]  ;;  %v36_v2 = vld [vmem:[%s848_s1 + $0x1] sm:$0xff] }
   0x2   :  { %v601_v3 = vpack.i.bf16 %v65_v1, %v64_v0  ;;  %v37_v4 = vld [vmem:[%s848_s1 + $0x9] sm:$0x3f]  ;;  %v66_v5 = vld [vmem:[%s848_s1 + $0x12] sm:$0xff]  ;;  %v67_v6 = vld [vmem:[%s848_s1 + $0x1a] sm:$0x3f] }
   0x3   :  { %v611_v7 = vpack.i.bf16 %v36_v2, %v37_v4  ;;  %v38_v8 = vld [vmem:[%s848_s1 + $0x2] sm:$0xff]  ;;  %v39_v9 = vld [vmem:[%s848_s1 + $0xa] sm:$0x3f]  ;;  %v606_v10 = vpack.i.bf16 %v67_v6, %v66_v5 }
   0x4   :  { %602 = vrot.lane.b32.xlu0 %v601_v3, %s657_s25  ;;  %v616_v11 = vpack.i.bf16 %v38_v8, %v39_v9  ;;  %v622_v12 = vld [vmem:[%s849_s2] sm:$0x3f]  }
   0x5   :  { %612 = vrot.lane.b32.xlu1 %v611_v7, %s657_s25  ;;  %588 = vmatprep.subr.msk.bf16.mxu0 %vm90_vm0, %v622_v12  ;;  %v122_v13 = vsel %vm90_vm0, %v622_v12, 0 }
   0x6   :  { %555 = vmatpush3.bf16.msra.mxu0 %v122_v13 }
   0x8   :  { %607 = vrot.lane.b32.xlu0 %v606_v10, %s658_s28 }
   0x9   :  { %617 = vrot.lane.b32.xlu1 %v616_v11, %s658_s28 }
   0xa   :  { %14 = vsyncpa [#allocation4], 0  ;;  %vm56_vm1 = vcmask 31744   ;;  %v63_v17 = vld [vmem:[%s848_s1 + $0x18] sm:$0x3f]  ;;  %v62_v20 = vld [vmem:[%s848_s1 + $0x10] sm:$0xff] }
   0xb   :  { %v35_v22 = vld [vmem:[%s848_s1 + $0x8] sm:$0x3f]  ;;  %vm59_vm2 = vcmask 64512   ;;  %v34_v24 = vld [vmem:[%s848_s1] sm:$0xff]  ;;  %vm114_vm3 = vcmask 97280   ;;  %vm180_vm4 = vcmask 60416  }
   0xc   :  { %v775_v44 = vld [vmem:[%s855_s8] ss:$0 sm:$0xff]  ;;  %v659_v58 = vmov 0.0   ;;  %vm660_vm5 = vmmov 0   ;;  %v661_v59 = vmov 0   ;;  %s662_s18 = smov 120  }
   0xd   :  { %v623_v56 = vld [vmem:[%s850_s3] sm:$0xff]   ;;  %560 = vmatprep.subr.bf16.mxu1 %v659_v58  ;;  %566 = vmatprep.subr.bf16.mxu0 %v659_v58  ;;  %s663_s19 = smov 108   ;;  %vm202_vm6 = vcmask 1046528   ;;  %vm222_vm7 = vcmask 130048   ;;  %v625_v9 = vld [vmem:[%s852_s5 + $0x8] sm:$0xff]   ;;  %vm276_vm8 = vcmask 96256  }
   0xe   :  { %561 = vmatpush3.bf16.msra.mxu1 %v623_v56  ;;  %562 = vmatprep.mubr.msk.bf16.mxu1 %vm660_vm5, %v659_v58  ;;  %v269_v62 = vld [vmem:[%s851_s4] sm:$0x7f]  ;;  %vm290_vm9 = vcmask 1040384   ;;  %s664_s24 = smov 96   ;;  %s665_s25 = smov 20   ;;  %vm312_vm10 = vcmask 162816  }
   0xf   :  { %574 = vmatprep.subr.bf16.mxu1 %v659_v58  ;;  %621 = vset.pattern.permute.xlu0 %v661_v59  ;;  %v624_v8 = vld [vmem:[%s852_s5] sm:$0xff]   ;;  %vm334_vm11 = vcmask 261120   ;;  %vm399_vm12 = vcmask 1043456   ;;  %vm395_vm13 = vcmask 195584   ;;  %vm507_vm14 = vcmask 7168  }
  0x10   :  { %vm509_vm15 = vcmask 25600  }
  0x76   :  { %v603_v14 = vpop.permute.xlu0 %602 }
  0x77   :  { %v605_v15 = vunpack.i.h.bf16 %v603_v14  ;;  %v613_v16 = vpop.permute.xlu1 %612  ;;  %v604_v18 = vunpack.i.l.bf16 %v603_v14 }
  0x78   :  { %v614_v19 = vunpack.i.l.bf16 %v613_v16  ;;  %v615_v21 = vunpack.i.h.bf16 %v613_v16 }
  0x79   :  { %v85_v25 = vsel %vm56_vm1, %v63_v17, %v605_v15  ;;  %v84_v29 = vsel %vm56_vm1, %v62_v20, %v604_v18 }
  0x7a   :  { %v608_v23 = vpop.permute.xlu0 %607  ;;  %v58_v30 = vsel %vm56_vm1, %v35_v22, %v614_v19  ;;  %v57_v35 = vsel %vm56_vm1, %v34_v24, %v615_v21 }
  0x7b   :  { %v610_v26 = vunpack.i.h.bf16 %v608_v23  ;;  %v609_v27 = vunpack.i.l.bf16 %v608_v23  ;;  %v618_v28 = vpop.permute.xlu1 %617 }
  0x7c   :  { %v620_v31 = vunpack.i.h.bf16 %v618_v28  ;;  %v619_v32 = vunpack.i.l.bf16 %v618_v28 }
  0x7d   :  { %v86_v33 = vsel %vm59_vm2, %v84_v29, %v609_v27  ;;  %v87_v34 = vsel %vm59_vm2, %v85_v25, %v610_v26 }
  0x7e   :  { %v91_v36 = vrot.slane %v86_v33, 2  ;;  %v92_v37 = vrot.slane %v87_v34, 2  ;;  %v61_v38 = vsel %vm59_vm2, %v58_v30, %v619_v32  ;;  %v60_v40 = vsel %vm59_vm2, %v57_v35, %v620_v31 }
  0x80   :  { %v93_v39 = vsel %vm90_vm0, %v91_v36, %v92_v37  ;;  %v97_v41 = vsel %vm90_vm0, %v61_v38, %v91_v36  ;;  %v626_v36 = vld [vmem:[%s853_s6] sm:$0xff]  }
  0x81   :  { %v98_v42 = vpack.c.bf16 %v97_v41, %v60_v40  ;;  %v99_v43 = vpack.c.bf16 %v92_v37, %v93_v39 }
  0x83   :  { %556 = vmatprep.mubr.msk.bf16.mxu0 %vm114_vm3, %v98_v42 }
  0x84   :  { %557 = vmatmul.mubr.msk.bf16.vlgmr.msra.gmra.mrb[0].mxu0 %vm114_vm3, %v99_v43 }
  0x85   :  { %570 = vmatprep.mubr.msk.bf16.mxu0 %vm660_vm5, %v659_v58  ;;  %567 = vmatpush3.bf16.msra.mxu0 %v624_v8 }
  0x86   :  { %568 = vmatprep.subr.bf16.mxu0 %v659_v58 }
  0x89   :  { %569 = vmatpush3.bf16.msra.mxu0 %v625_v9 }
  0x8a   :  { %582 = vmatprep.subr.bf16.mxu0 %v659_v58 }
 0x157   :  { %v558_v45 = vpop.f32.mrb[0].mxu0 }
 0x158   :  { %v167_v46 = vadd.f32 %v558_v45, %v775_v44  ;;  %v158_v47 = vpop.f32.mrb[1].mxu0 }
 0x159   :  { %v159_v48 = vadd.f32 %v775_v44, %v158_v47  ;;  %v559_v49 = vpop.f32.mrb[2].mxu0 }
 0x15a   :  { %v175_v50 = vmax.f32 %v167_v46, 0.0  ;;  %v170_v51 = vadd.f32 %v559_v49, %v775_v44  ;;  %v161_v52 = vpop.f32.mrb[3].mxu0  ;;  %v307_v46 = vld [vmem:[%s847_s0] sm:$0x3]  ;;  %s666_s0 = smov 72  }
 0x15b   :  { %v173_v53 = vmax.f32 %v159_v48, 0.0  ;;  %v162_v54 = vadd.f32 %v775_v44, %v161_v52  ;;  %v628_v52 = vld [vmem:[%s854_s7] sm:$0xff]   ;;  %s668_s7 = smov [#allocation3]  }
 0x15c   :  { %179 = vst.msk [vmem:[#allocation2 + $0x10] sm:$0xff] %vm59_vm2, %v175_v50  ;;  %v176_v55 = vmax.f32 %v170_v51, 0.0  ;;  %v627_v50 = vld [vmem:[%s853_s6 + $0x8] ss:$0 sps:$4 sm:$0xff]   ;;  %s667_s6 = smov 56   ;;  %s517_s10 = sshll.u32 %s668_s7, 4  ;;  %s518_s10 = int_to_ptr.vmem [resolvable:$true] %s517_s10 }
 0x15d   :  { %177 = vst.msk [vmem:[#allocation2] sm:$0xff] %vm59_vm2, %v173_v53  ;;  %v174_v57 = vmax.f32 %v162_v54, 0.0  ;;  %v401_v51 = vsel %vm399_vm12, %v627_v50, 0  ;;  %s633_s11 = scalar_lea.vmem %s518_s10, 32  ;;  %p638_p1 = scmp.lt.s32.totalorder %s518_s10, %s518_s10 }
 0x15e   :  { %181 = vst.msk [vmem:[#allocation2 + $0x18] sm:$0xf] %vm180_vm4, %v176_v55  ;;  %p634_p0 = scmp.ne.s32.totalorder %s518_s10, %s633_s11  ;;  %p639_p2 = scmp.lt.s32.totalorder %s633_s11, %s633_s11 }
 0x15f   :  { %178 = vst.msk [vmem:[#allocation2 + $0x8] sm:$0xff] %vm59_vm2, %v174_v57 }
 0x160   :  { %p640_p3 = por %p639_p2, %p638_p1 }
 0x162   :  { %p641_p4 = pnand %p640_p3, %p634_p0 }
 0x166   :  { %v193_v60 = vld [vmem:[#allocation2 + $0xf] ss:$2 sm:$0x7f]  ;;  %v184_v61 = vld [vmem:[#allocation2 + $0x1] ss:$2 sm:$0x7f] }
 0x167   :  { %195 = vrot.lane.b32.xlu0 %v193_v60, %s658_s28  ;;  %186 = vrot.lane.b32.xlu1 %v184_v61, %s658_s28  ;;  %v191_v0 = vld [vmem:[#allocation2 + $0xe] ss:$2 sm:$0x7f]  ;;  %v182_v4 = vld [vmem:[#allocation2] ss:$2 sm:$0x7f] }
 0x16b   :  { %272 = vperm.xlu0 %621, %v269_v62   ;;  %219 = vrot.lane.b32.xlu1 %v775_v44, %s662_s18 }
 0x16f   :  { %303 = vrot.lane.b32.xlu1 %v775_v44, %s663_s19 }
 0x173   :  { %331 = vrot.lane.b32.xlu1 %v775_v44, %s664_s24 }
 0x177   :  { %453 = vrot.lane.b32.xlu1 %v775_v44, %s667_s6 }
 0x1d9   :  { %v196_v63 = vpop.permute.xlu0 %195  ;;  %v187_v1 = vpop.permute.xlu1 %186 }
 0x1da   :  { %v198_v2 = vsel %vm59_vm2, %v191_v0, %v196_v63  ;;  %v189_v5 = vsel %vm59_vm2, %v182_v4, %v187_v1 }
 0x1db   :  { %v200_v3 = vrot.slane %v198_v2, 1 }
 0x1dd   :  { %v203_v6 = vsel %vm202_vm6, %v189_v5, %v200_v3  ;;  %v220_v10 = vpop.permute.xlu1 %219 }
 0x1de   :  { %v204_v7 = vpack.c.bf16 %v200_v3, %v203_v6 }
 0x1e0   :  { %563 = vmatmul.mubr.msk.bf16.vlgmr.msra.gmra.mrb[0].mxu1 %vm222_vm7, %v204_v7 }
 0x1e1   :  { %578 = vmatprep.mubr.msk.bf16.mxu1 %vm660_vm5, %v659_v58  ;;  %575 = vmatpush3.bf16.msra.mxu1 %v626_v36  ;;  %v304_v40 = vpop.permute.xlu1 %303 }
 0x1e2   :  { %576 = vmatprep.subr.bf16.mxu1 %v659_v58 }
 0x1e5   :  { %577 = vmatpush3.bf16.msra.mxu1 %v401_v51  ;;  %v332_v53 = vpop.permute.xlu1 %331 }
 0x1e9   :  { %v454_v5 = vpop.permute.xlu1 %453 }
 0x1ea   :  { %v273_v11 = vpop.permute.xlu0 %272 }
 0x1eb   :  { %v284_v15 = vrot.slane %v273_v11, 1 }
 0x2b3   :  { %v260_v12 = vpop.f32.mrb[0].mxu1 }
 0x2b4   :  { %v261_v13 = vadd.f32 %v260_v12, %v220_v10  ;;  %v564_v14 = vpop.f32.mrb[1].mxu1 }
 0x2b5   :  { %v263_v16 = vpop.f32.mrb[2].mxu1 }
 0x2b6   :  { %v267_v17 = vmax.f32 %v261_v13, 0.0  ;;  %v264_v18 = vadd.f32 %v263_v16, %v220_v10  ;;  %v565_v19 = vpop.f32.mrb[3].mxu1 }
 0x2b8   :  { %v275_v20 = vmul.f32 %v273_v11, %v267_v17  ;;  %v286_v21 = vmul.f32 %v284_v15, %v267_v17  ;;  %v268_v22 = vmax.f32 %v264_v18, 0.0 }
 0x2ba   :  { %v277_v23 = vsel %vm276_vm8, %v275_v20, 0.0  ;;  %v287_v24 = vmul.f32 %v284_v15, %v268_v22  ;;  %v291_v26 = vrot.slane %v286_v21, 7 }
 0x2bb   :  { %v278_v25 = vrot.slane %v277_v23, 4 }
 0x2bc   :  { %v292_v27 = vrot.slane %v287_v24, 7 }
 0x2bd   :  { %v279_v28 = vadd.f32 %v278_v25, %v277_v23 }
 0x2be   :  { %v293_v29 = vsel %vm290_vm9, %v291_v26, %v292_v27 }
 0x2bf   :  { %v280_v30 = vrot.slane %v279_v28, 2  ;;  %v295_v31 = vsel %vm276_vm8, %v293_v29, 0.0 }
 0x2c0   :  { %v296_v32 = vrot.slane %v295_v31, 4 }
 0x2c1   :  { %v281_v33 = vadd.f32 %v280_v30, %v279_v28 }
 0x2c2   :  { %v297_v34 = vadd.f32 %v296_v32, %v295_v31 }
 0x2c3   :  { %v282_v37 = vrot.slane %v281_v33, 1 }
 0x2c4   :  { %v298_v35 = vrot.slane %v297_v34, 2 }
 0x2c5   :  { %v283_v41 = vadd.f32 %v282_v37, %v281_v33 }
 0x2c6   :  { %v299_v38 = vadd.f32 %v298_v35, %v297_v34 }
 0x2c8   :  { %v300_v39 = vrot.slane %v299_v38, 1 }
 0x2ca   :  { %v301_v42 = vadd.f32 %v300_v39, %v299_v38 }
 0x2cc   :  { %v302_v43 = vsel %vm290_vm9, %v283_v41, %v301_v42 }
 0x2cd   :  { %v306_v45 = vadd.f32 %v304_v40, %v302_v43 }
 0x2cf   :  { %309 = vrot.lane.b32.xlu0 %v306_v45, %s665_s25 }
 0x2d3   :  { %392 = vrot.lane.b32.xlu0 %v775_v44, %s666_s0 }
 0x341   :  { %v310_v47 = vpop.permute.xlu0 %309 }
 0x342   :  { %v313_v48 = vsel %vm312_vm10, %v307_v46, %v310_v47 }
 0x343   :  { %v314_v49 = vpack.c.bf16 %v313_v48, %v313_v48 }
 0x345   :  { %571 = vmatmul.mubr.msk.bf16.vlgmr.msra.gmra.mrb[4].mxu0 %vm334_vm11, %v314_v49  ;;  %v393_v61 = vpop.permute.xlu0 %392 }
 0x346   :  { %584 = vmatprep.mubr.msk.bf16.mxu0 %vm660_vm5, %v659_v58  ;;  %583 = vmatpush3.bf16.msra.mxu0 %v628_v52 }
 0x418   :  { %v372_v54 = vpop.f32.mrb[4].mxu0 }
 0x419   :  { %v373_v55 = vadd.f32 %v372_v54, %v332_v53  ;;  %v572_v56 = vpop.f32.mrb[5].mxu0 }
 0x41a   :  { %v375_v57 = vpop.f32.mrb[6].mxu0 }
 0x41b   :  { %v378_v58 = vmax.f32 %v373_v55, 0.0  ;;  %v573_v59 = vpop.f32.mrb[7].mxu0 }
 0x41d   :  { %v379_v60 = vpack.c.bf16 %v378_v58, %v378_v58 }
 0x41f   :  { %579 = vmatmul.mubr.msk.bf16.vlgmr.msra.gmra.mrb[4].mxu1 %vm395_vm13, %v379_v60 }
 0x4f2   :  { %v437_v62 = vpop.f32.mrb[4].mxu1 }
 0x4f3   :  { %v438_v63 = vadd.f32 %v437_v62, %v393_v61  ;;  %v580_v0 = vpop.f32.mrb[5].mxu1 }
 0x4f4   :  { %v440_v1 = vpop.f32.mrb[6].mxu1 }
 0x4f5   :  { %v443_v2 = vmax.f32 %v438_v63, 0.0  ;;  %v581_v3 = vpop.f32.mrb[7].mxu1 }
 0x4f7   :  { %v444_v4 = vpack.c.bf16 %v443_v2, %v443_v2 }
 0x4f9   :  { %585 = vmatmul.mubr.msk.bf16.vlgmr.msra.gmra.mrb[8].mxu0 %vm222_vm7, %v444_v4 }
 0x5cc   :  { %v493_v6 = vpop.f32.mrb[8].mxu0 }
 0x5cd   :  { %v494_v7 = vadd.f32 %v493_v6, %v454_v5  ;;  %v586_v8 = vpop.f32.mrb[9].mxu0 }
 0x5ce   :  { %v496_v9 = vpop.f32.mrb[10].mxu0 }
 0x5cf   :  { %v540_v10 = vmul.f32 -1.442695, %v494_v7  ;;  %v587_v11 = vpop.f32.mrb[11].mxu0 }
 0x5d1   :  { %629 = vpow2.f32 %v540_v10 }
 0x5db   :  { %v630_v12 = vpop.eup %629 }
 0x5dc   :  { %v502_v44 = vadd.f32 1.0, %v630_v12 }
 0x5de   :  { %631 = vrcp.f32 %v502_v44 }
 0x5e8   :  { %v632_v13 = vpop.eup %631 }
 0x5e9   :  { %v505_v14 = vmul.f32 10.0, %v632_v13 }
 0x5eb   :  { %v508_v15 = vsel %vm507_vm14, %v505_v14, %v494_v7 }
 0x5ec   :  { %510 = vst.msk [vmem:[#allocation3] sm:$0x3] %vm509_vm15, %v508_v15 }
 0x5ed   :  { %644 = shalt.err (!%p641_p4)
}
 0x5ee   :  { %s645_s14 = scalar_lea.hbm %s856_s9, 32 }
 0x5ef   :  { %p646_p5 = scmp.ne.s32.totalorder %s856_s9, %s645_s14  ;;  %p649_p6 = scmp.lt.u32.totalorder %s645_s14, %s856_s9 }
 0x5f1   :  { %p651_p7 = pnand %p649_p6, %p646_p5 }
 0x5f3   :  { %654 = shalt.err (!%p651_p7)
}
 0x5f4   :  { %520 = dma.vmem_to_hbm [thread:$0]  %s518_s10, 32, %s856_s9, [#allocation4]  }
 0x5f5   :  { %655 = dma.done.wait [#allocation4], 32  }
 0x5f6   :  { %656 = vsyncadd [#allocation4], 4294967264 }
 0x5f7   :  { %524 = vsyncpa [#allocation4], 1 }

</bundles_post_ra>
